<compile_context>
chip_gen: v7x
topology: tpu7x:2x2x1
jax: 0.10.0
libtpu: 0.0.40
codegen_flags: <defaults>
</compile_context>

<pallas_src>
import functools

import jax
import jax.numpy as jnp
from jax.experimental import pallas as pl
from jax.experimental.pallas import tpu as pltpu

BN_EPS = 1e-5
EXPANSION = 4
LANE = 128                      # lane-dense channel padding
VMEM_LIMIT = 48 * 1024 * 1024   # fits v7x (64 MiB / TC) with headroom


# ----------------------------------------------------------------------------
# small helpers
# ----------------------------------------------------------------------------
def _round_up(x, m):
    return (x + m - 1) // m * m


def _pick_tile(n, candidates):
    for c in candidates:
        if n % c == 0:
            return c
    return n


def _pad_axis(x, axis, size):
    if x.shape[axis] == size:
        return x
    pad = [(0, 0)] * x.ndim
    pad[axis] = (0, size - x.shape[axis])
    return jnp.pad(x, pad)


# ----------------------------------------------------------------------------
# Pallas kernels
# ----------------------------------------------------------------------------
def _matmul_bn_kernel(a_ref, b_ref, scale_ref, shift_ref,
                      o_ref, s_ref, q_ref, acc_ref,
                      *, fuse_in_bn, mask_rows, tm):
    """Tiled (M,K)@(K,N) with a K-reduction grid axis.

    Optionally applies a per-K-channel affine + ReLU (a previous BN) to the A
    tile before the dot (fuse_in_bn), and emits BN partial sums of the f32
    accumulator in the epilogue.  Output is written in bf16.
    """
    k = pl.program_id(2)

    @pl.when(k == 0)
    def _init():
        acc_ref[...] = jnp.zeros_like(acc_ref)

    a = a_ref[...]
    if fuse_in_bn:
        a = a.astype(jnp.float32) * scale_ref[...] + shift_ref[...]
        a = jnp.maximum(a, 0.0)
        if mask_rows is not None:
            # zero-padded rows became `shift` after the affine; re-zero them so
            # the BN stats of *this* conv stay exact.
            rows = (jax.lax.broadcasted_iota(jnp.int32, a.shape, 0)
                    + pl.program_id(0) * tm)
            a = jnp.where(rows < mask_rows, a, 0.0)
        a = a.astype(b_ref.dtype)

    acc_ref[...] += jnp.dot(a, b_ref[...], preferred_element_type=jnp.float32)

    @pl.when(k == pl.num_programs(2) - 1)
    def _finalize():
        acc = acc_ref[...]
        o_ref[...] = acc.astype(o_ref.dtype)
        s_ref[...] = jnp.sum(acc, axis=0).reshape(1, 1, -1)
        q_ref[...] = jnp.sum(acc * acc, axis=0).reshape(1, 1, -1)


def _conv3x3_bn_kernel(*args, n_planes, taps, R, Wo):
    """R output rows of a 3x3 conv: 9 tap matmuls accumulated in a local value.

    args = (plane_0 .. plane_{P-1}, w_ref, o_ref, s_ref, q_ref).
    Each tap is (plane_index, row_offset, col_offset) into a contiguous phase
    plane, so only contiguous pl.ds slices are used (no strided ref reads).
    """
    plane_refs = args[:n_planes]
    w_ref = args[n_planes]
    o_ref, s_ref, q_ref = args[n_planes + 1:n_planes + 4]
    Cp = plane_refs[0].shape[-1]
    Co = o_ref.shape[-1]

    base = pl.program_id(1) * R
    acc = jnp.zeros((R * Wo, Co), jnp.float32)
    for t, (p, ra, ca) in enumerate(taps):
        a = plane_refs[p][pl.ds(base + ra, R), pl.ds(ca, Wo), :]
        a = a.reshape(R * Wo, Cp)
        wt = w_ref[pl.ds(t * Cp, Cp), :]
        acc = acc + jnp.dot(a, wt, preferred_element_type=jnp.float32)

    o_ref[...] = acc.reshape(R, Wo, Co).astype(o_ref.dtype)
    s_ref[...] = jnp.sum(acc, axis=0).reshape(1, 1, Co)
    q_ref[...] = jnp.sum(acc * acc, axis=0).reshape(1, 1, Co)


def _bn_act_kernel(x_ref, scale_ref, shift_ref, o_ref, *, relu):
    y = x_ref[...].astype(jnp.float32) * scale_ref[...] + shift_ref[...]
    if relu:
        y = jnp.maximum(y, 0.0)
    o_ref[...] = y.astype(o_ref.dtype)


def _bn_residual_act_kernel(x_ref, scale_ref, shift_ref,
                            r_ref, rscale_ref, rshift_ref, o_ref):
    y = x_ref[...].astype(jnp.float32) * scale_ref[...] + shift_ref[...]
    y = y + r_ref[...].astype(jnp.float32) * rscale_ref[...] + rshift_ref[...]
    o_ref[...] = jnp.maximum(y, 0.0).astype(o_ref.dtype)


# ----------------------------------------------------------------------------
# wrappers
# ----------------------------------------------------------------------------
def _conv1x1_bn(a, w, m_real, in_scale=None, in_shift=None):
    """a: (M, K) bf16 (channels padded to 128); w: (K, Nc) bf16.

    Optionally fuses a per-K-channel BN apply + ReLU into the matmul prologue.
    Returns (out bf16 (Mp, Nc), mean (Nc,), var (Nc,))."""
    M, K = a.shape
    Nc = w.shape[1]
    M8 = _round_up(M, 8)
    tm = _pick_tile(M8, (512, 256, 128, 64, 32, 16, 8))
    Mp = _round_up(M8, tm)
    if Mp != M:
        a = _pad_axis(a, 0, Mp)
    tn = _pick_tile(Nc, (512, 256, 128))
    tk = _pick_tile(K, (512, 256, 128))
    gm, gn, gk = Mp // tm, Nc // tn, K // tk

    fuse = in_scale is not None
    if fuse:
        in_scale = in_scale.reshape(1, K).astype(jnp.float32)
        in_shift = in_shift.reshape(1, K).astype(jnp.float32)
    else:
        in_scale = jnp.ones((1, K), jnp.float32)
        in_shift = jnp.zeros((1, K), jnp.float32)
    mask_rows = m_real if (fuse and Mp > m_real) else None

    kernel = functools.partial(_matmul_bn_kernel, fuse_in_bn=fuse,
                               mask_rows=mask_rows, tm=tm)
    out, psum, psq = pl.pallas_call(
        kernel,
        grid=(gm, gn, gk),
        out_shape=(
            jax.ShapeDtypeStruct((Mp, Nc), jnp.bfloat16),
            jax.ShapeDtypeStruct((gm, 1, Nc), jnp.float32),
            jax.ShapeDtypeStruct((gm, 1, Nc), jnp.float32),
        ),
        in_specs=[
            pl.BlockSpec((tm, tk), lambda i, j, k: (i, k)),
            pl.BlockSpec((tk, tn), lambda i, j, k: (k, j)),
            pl.BlockSpec((1, tk), lambda i, j, k: (0, k)),
            pl.BlockSpec((1, tk), lambda i, j, k: (0, k)),
        ],
        out_specs=(
            pl.BlockSpec((tm, tn), lambda i, j, k: (i, j)),
            pl.BlockSpec((1, 1, tn), lambda i, j, k: (i, 0, j)),
            pl.BlockSpec((1, 1, tn), lambda i, j, k: (i, 0, j)),
        ),
        scratch_shapes=[pltpu.VMEM((tm, tn), jnp.float32)],
        compiler_params=pltpu.CompilerParams(
            dimension_semantics=("parallel", "parallel", "arbitrary"),
            vmem_limit_bytes=VMEM_LIMIT),
        cost_estimate=pl.CostEstimate(
            flops=2 * Mp * K * Nc,
            transcendentals=0,
            bytes_accessed=2 * (Mp * K * gn + K * Nc * gm + Mp * Nc)),
    )(a, w, in_scale, in_shift)

    # Shifted-moment variance from f32 sums (biased, as PyTorch training BN).
    mean = jnp.sum(psum.reshape(gm, Nc), axis=0) / m_real
    var = jnp.maximum(jnp.sum(psq.reshape(gm, Nc), axis=0) / m_real
                      - mean * mean, 0.0)
    return out, mean, var


def _conv3x3_bn(x, w, stride):
    """x: (N, H, W, Cp) bf16, w: (3, 3, Cp, Co) bf16.  Pad=1 conv + BN stats."""
    N, H, W, Cp = x.shape
    Co = w.shape[-1]
    Ho = (H - 1) // stride + 1
    Wo = (W - 1) // stride + 1

    if stride == 1:
        xp = jnp.pad(x, ((0, 0), (1, 1), (1, 1), (0, 0)))
        planes = [xp]
        taps = tuple((0, di, dj) for di in range(3) for dj in range(3))
    else:  # stride == 2: phase decomposition -> only contiguous slices in-kernel
        hpad, wpad = 2 * (Ho + 1), 2 * (Wo + 1)
        xp = jnp.pad(x, ((0, 0), (1, hpad - H - 1), (1, wpad - W - 1), (0, 0)))
        planes = [xp[:, p::2, q::2, :] for p in range(2) for q in range(2)]
        taps = tuple((2 * (di % 2) + (dj % 2), di // 2, dj // 2)
                     for di in range(3) for dj in range(3))
    n_planes = len(planes)
    Pr, Pc = planes[0].shape[1], planes[0].shape[2]

    # Output-row block: the largest divisor of Ho (<= 8) with a bounded f32 acc.
    R = 1
    for cand in range(min(Ho, 8), 0, -1):
        if Ho % cand == 0 and cand * Wo * Co * 4 <= 512 * 1024:
            R = cand
            break
    n_rb = Ho // R

    w_flat = w.reshape(9 * Cp, Co)
    kernel = functools.partial(_conv3x3_bn_kernel, n_planes=n_planes,
                               taps=taps, R=R, Wo=Wo)
    plane_spec = pl.BlockSpec((None, Pr, Pc, Cp), lambda n, rb: (n, 0, 0, 0))

    out, psum, psq = pl.pallas_call(
        kernel,
        grid=(N, n_rb),
        out_shape=(
            jax.ShapeDtypeStruct((N, Ho, Wo, Co), jnp.bfloat16),
            jax.ShapeDtypeStruct((N * n_rb, 1, Co), jnp.float32),
            jax.ShapeDtypeStruct((N * n_rb, 1, Co), jnp.float32),
        ),
        in_specs=[plane_spec] * n_planes + [
            pl.BlockSpec((9 * Cp, Co), lambda n, rb: (0, 0)),
        ],
        out_specs=(
            pl.BlockSpec((None, R, Wo, Co), lambda n, rb: (n, rb, 0, 0)),
            pl.BlockSpec((1, 1, Co), lambda n, rb: (n * n_rb + rb, 0, 0)),
            pl.BlockSpec((1, 1, Co), lambda n, rb: (n * n_rb + rb, 0, 0)),
        ),
        compiler_params=pltpu.CompilerParams(
            dimension_semantics=("parallel", "parallel"),
            vmem_limit_bytes=VMEM_LIMIT),
        cost_estimate=pl.CostEstimate(
            flops=2 * N * Ho * Wo * 9 * Cp * Co,
            transcendentals=0,
            bytes_accessed=2 * (N * n_planes * Pr * Pc * Cp + 9 * Cp * Co
                                + N * Ho * Wo * Co)),
    )(*planes, w_flat)

    M2 = N * Ho * Wo
    mean = jnp.sum(psum.reshape(-1, Co), axis=0) / M2
    var = jnp.maximum(jnp.sum(psq.reshape(-1, Co), axis=0) / M2 - mean * mean,
                      0.0)
    return out, mean, var, (Ho, Wo)


def _bn_scale_shift(mean, var, gamma, beta):
    scale = gamma * jax.lax.rsqrt(var + BN_EPS)
    shift = beta - mean * scale
    return scale.reshape(1, -1), shift.reshape(1, -1)


def _bn_act(x, scale, shift, *, relu, out_dtype):
    M, C = x.shape
    tr = _pick_tile(M, (2048, 1024, 512, 256, 128, 64, 32, 16, 8))
    return pl.pallas_call(
        functools.partial(_bn_act_kernel, relu=relu),
        grid=(M // tr,),
        out_shape=jax.ShapeDtypeStruct((M, C), out_dtype),
        in_specs=[
            pl.BlockSpec((tr, C), lambda i: (i, 0)),
            pl.BlockSpec((1, C), lambda i: (0, 0)),
            pl.BlockSpec((1, C), lambda i: (0, 0)),
        ],
        out_specs=pl.BlockSpec((tr, C), lambda i: (i, 0)),
        compiler_params=pltpu.CompilerParams(
            dimension_semantics=("parallel",),
            vmem_limit_bytes=VMEM_LIMIT),
    )(x, scale, shift)


def _bn_residual_act(x, scale, shift, r, rscale, rshift):
    M, C = x.shape
    tr = _pick_tile(M, (2048, 1024, 512, 256, 128, 64, 32, 16, 8))
    return pl.pallas_call(
        _bn_residual_act_kernel,
        grid=(M // tr,),
        out_shape=jax.ShapeDtypeStruct((M, C), jnp.float32),
        in_specs=[
            pl.BlockSpec((tr, C), lambda i: (i, 0)),
            pl.BlockSpec((1, C), lambda i: (0, 0)),
            pl.BlockSpec((1, C), lambda i: (0, 0)),
            pl.BlockSpec((tr, C), lambda i: (i, 0)),
            pl.BlockSpec((1, C), lambda i: (0, 0)),
            pl.BlockSpec((1, C), lambda i: (0, 0)),
        ],
        out_specs=pl.BlockSpec((tr, C), lambda i: (i, 0)),
        compiler_params=pltpu.CompilerParams(
            dimension_semantics=("parallel",),
            vmem_limit_bytes=VMEM_LIMIT),
    )(x, scale, shift, r, rscale, rshift)


# ----------------------------------------------------------------------------
# Bottleneck forward
# ----------------------------------------------------------------------------
def bottleneck_forward(x_nchw, params, stride):
    N, Cin, H, W = x_nchw.shape
    planes = params["planes"]
    cout = EXPANSION * planes
    cin_p = _round_up(Cin, LANE)
    pln_p = _round_up(planes, LANE)
    co_p = _round_up(cout, LANE)

    # NCHW -> NHWC, lane-dense (zero-padded) channels.
    x_nhwc = _pad_axis(jnp.transpose(x_nchw, (0, 2, 3, 1)), 3, cin_p)
    x_bf = x_nhwc.astype(jnp.bfloat16)
    M1 = N * H * W

    # conv1 (1x1) + BN1 stats
    out1, m1, v1 = _conv1x1_bn(x_bf.reshape(M1, cin_p), params["w1"], M1)
    if out1.shape[0] != M1:
        out1 = out1[:M1]
    s1, b1 = _bn_scale_shift(m1, v1, params["g1"], params["b1"])
    a1 = _bn_act(out1, s1, b1, relu=True, out_dtype=jnp.bfloat16)

    # conv2 (3x3, stride, pad=1) + BN2 stats  -- no HBM im2col
    out2, m2, v2, (Ho, Wo) = _conv3x3_bn(a1.reshape(N, H, W, pln_p),
                                         params["w2"], stride)
    s2, b2 = _bn_scale_shift(m2, v2, params["g2"], params["b2"])
    M2 = N * Ho * Wo

    # conv3 (1x1) with BN2-apply + ReLU fused into the matmul prologue; BN3 stats
    out3, m3, v3 = _conv1x1_bn(out2.reshape(M2, pln_p), params["w3"], M2,
                               in_scale=s2, in_shift=b2)
    if out3.shape[0] != M2:
        out3 = out3[:M2]
    s3, b3 = _bn_scale_shift(m3, v3, params["g3"], params["b3"])

    # shortcut branch
    if "ws" in params:
        xs = x_bf[:, ::stride, ::stride, :] if stride != 1 else x_bf
        sc, ms, vs = _conv1x1_bn(xs.reshape(M2, cin_p), params["ws"], M2)
        if sc.shape[0] != M2:
            sc = sc[:M2]
        ss, bs = _bn_scale_shift(ms, vs, params["gs"], params["bs"])
    else:
        # identity (stride == 1 and Cin == expansion*planes)
        sc = x_bf.reshape(M1, cin_p)
        ss = jnp.ones((1, co_p), jnp.float32)
        bs = jnp.zeros((1, co_p), jnp.float32)

    # BN3 apply + shortcut BN apply + residual add + ReLU, fused
    y = _bn_residual_act(out3, s3, b3, sc, ss, bs)

    if co_p != cout:
        y = y[:, :cout]
    y = y.reshape(N, Ho, Wo, cout)
    return jnp.transpose(y, (0, 3, 1, 2))  # NCHW


# ----------------------------------------------------------------------------
# Deterministic parameter init (synthetic; shapes follow the PyTorch module).
# Real PyTorch weights would map as: 1x1 conv  w.squeeze(-1).squeeze(-1).T,
#                                    3x3 conv  w.transpose(2, 3, 1, 0).
# ----------------------------------------------------------------------------
def init_params(key, in_planes, planes, stride):
    cout = EXPANSION * planes
    cin_p = _round_up(in_planes, LANE)
    pln_p = _round_up(planes, LANE)
    co_p = _round_up(cout, LANE)
    ks = jax.random.split(key, 4)

    def conv_w(k, real_shape, pad_shape, fan_in):
        std = (2.0 / fan_in) ** 0.5
        w = std * jax.random.normal(k, real_shape, jnp.float32)
        pad = [(0, p - r) for r, p in zip(real_shape, pad_shape)]
        return jnp.pad(w, pad).astype(jnp.bfloat16)

    def bn_gamma(c, cp):
        return jnp.pad(jnp.ones((c,), jnp.float32), (0, cp - c))

    p = {
        "planes": planes,
        "w1": conv_w(ks[0], (in_planes, planes), (cin_p, pln_p), in_planes),
        "g1": bn_gamma(planes, pln_p), "b1": jnp.zeros((pln_p,), jnp.float32),
        "w2": conv_w(ks[1], (3, 3, planes, planes), (3, 3, pln_p, pln_p),
                     9 * planes),
        "g2": bn_gamma(planes, pln_p), "b2": jnp.zeros((pln_p,), jnp.float32),
        "w3": conv_w(ks[2], (planes, cout), (pln_p, co_p), planes),
        "g3": bn_gamma(cout, co_p), "b3": jnp.zeros((co_p,), jnp.float32),
    }
    if stride != 1 or in_planes != cout:
        p["ws"] = conv_w(ks[3], (in_planes, cout), (cin_p, co_p), in_planes)
        p["gs"] = bn_gamma(cout, co_p)
        p["bs"] = jnp.zeros((co_p,), jnp.float32)
    return p


# ----------------------------------------------------------------------------
# Pure-JAX reference (f32 everywhere except the same bf16-rounded weights/input)
# ----------------------------------------------------------------------------
def _reference_forward(x_nchw, params, stride):
    planes = params["planes"]
    cout = EXPANSION * planes
    Cin = x_nchw.shape[1]

    def bn(z, gamma, beta):
        mean = jnp.mean(z, axis=(0, 1, 2))
        var = jnp.mean((z - mean) ** 2, axis=(0, 1, 2))
        return (z - mean) * jax.lax.rsqrt(var + BN_EPS) * gamma + beta

    xn = jnp.transpose(x_nchw, (0, 2, 3, 1)).astype(jnp.bfloat16)
    xn = xn.astype(jnp.float32)
    w1 = params["w1"][:Cin, :planes].astype(jnp.float32)
    w2 = params["w2"][:, :, :planes, :planes].astype(jnp.float32)
    w3 = params["w3"][:planes, :cout].astype(jnp.float32)

    out = jnp.maximum(bn(jnp.einsum("nhwc,cd->nhwd", xn, w1),
                         params["g1"][:planes], params["b1"][:planes]), 0.0)
    out = jax.lax.conv_general_dilated(
        out, w2, window_strides=(stride, stride), padding=((1, 1), (1, 1)),
        dimension_numbers=("NHWC", "HWIO", "NHWC"))
    out = jnp.maximum(bn(out, params["g2"][:planes], params["b2"][:planes]),
                      0.0)
    out = bn(jnp.einsum("nhwc,cd->nhwd", out, w3),
             params["g3"][:cout], params["b3"][:cout])

    if "ws" in params:
        ws = params["ws"][:Cin, :cout].astype(jnp.float32)
        xs = xn[:, ::stride, ::stride, :] if stride != 1 else xn
        sc = bn(jnp.einsum("nhwc,cd->nhwd", xs, ws),
                params["gs"][:cout], params["bs"][:cout])
    else:
        sc = xn
    y = jnp.maximum(out + sc, 0.0)
    return jnp.transpose(y, (0, 3, 1, 2))


if __name__ == "__main__":
    key = jax.random.PRNGKey(0)
    kx, kp = jax.random.split(key)

    # Small shapes: batch=2, in_planes=8, spatial=8x8, planes=4, stride=2
    N, in_planes, H, W = 2, 8, 8, 8
    planes, stride = 4, 2

    x = jax.random.normal(kx, (N, in_planes, H, W), jnp.float32)
    params = init_params(kp, in_planes, planes, stride)

    y = jax.block_until_ready(bottleneck_forward(x, params, stride))

    Ho = (H - 1) // stride + 1
    Wo = (W - 1) // stride + 1
    assert y.shape == (N, EXPANSION * planes, Ho, Wo), y.shape
    assert bool(jnp.all(jnp.isfinite(y)))
    assert bool(jnp.all(y >= 0.0))  # final ReLU

    y_ref = jax.block_until_ready(_reference_forward(x, params, stride))
    err = float(jnp.max(jnp.abs(y - y_ref)))
    assert err < 0.2, f"max abs error vs reference: {err}"

    print("KERNEL_OK")
</pallas_src>

<mosaic_0001>
module attributes {stable_mosaic.version = 11 : i64} {
  func.func @_matmul_bn_kernel(%arg0: i32, %arg1: i32, %arg2: i32, %arg3: memref<128x128xbf16, #tpu.memory_space<vmem>>, %arg4: memref<128x128xbf16, #tpu.memory_space<vmem>>, %arg5: memref<1x128xf32, #tpu.memory_space<vmem>>, %arg6: memref<1x128xf32, #tpu.memory_space<vmem>>, %arg7: memref<128x128xbf16, #tpu.memory_space<vmem>>, %arg8: memref<1x1x128xf32, #tpu.memory_space<vmem>>, %arg9: memref<1x1x128xf32, #tpu.memory_space<vmem>>, %arg10: memref<128x128xf32, #tpu.memory_space<vmem>>) attributes {dimension_semantics = [#tpu.dimension_semantics<parallel>, #tpu.dimension_semantics<parallel>, #tpu.dimension_semantics<arbitrary>], iteration_bounds = array<i64: 1, 1, 1>, scalar_prefetch = 0 : i64, scratch_operands = 1 : i64, tpu.core_type = #tpu.core_type<tc>, window_params = [{transform_indices = @transform_0, window_bounds = array<i64: 128, 128>}, {transform_indices = @transform_1, window_bounds = array<i64: 128, 128>}, {transform_indices = @transform_2, window_bounds = array<i64: 1, 128>}, {transform_indices = @transform_3, window_bounds = array<i64: 1, 128>}, {transform_indices = @transform_4, window_bounds = array<i64: 128, 128>}, {transform_indices = @transform_5, window_bounds = array<i64: 1, 1, 128>}, {transform_indices = @transform_6, window_bounds = array<i64: 1, 1, 128>}]} {
    %c0_i32 = arith.constant 0 : i32
    %0 = arith.cmpi eq, %arg2, %c0_i32 : i32
    %1 = arith.extui %0 : i1 to i32
    %c0_i32_0 = arith.constant 0 : i32
    %2 = arith.cmpi ne, %1, %c0_i32_0 : i32
    scf.if %2 {
      %cst_10 = arith.constant 0.000000e+00 : f32
      %12 = vector.broadcast %cst_10 : f32 to vector<128x128xf32>
      %c0_11 = arith.constant 0 : index
      %c0_12 = arith.constant 0 : index
      %13 = vector.load %arg10[%c0_11, %c0_12] : memref<128x128xf32, #tpu.memory_space<vmem>>, vector<128x128xf32>
      tpu.vector_store %arg10[%c0_11, %c0_12], %12 {strides = array<i32>} : memref<128x128xf32, #tpu.memory_space<vmem>>, vector<128x128xf32>,
    } else {
    }
    %c0 = arith.constant 0 : index
    %c0_1 = arith.constant 0 : index
    %3 = vector.load %arg3[%c0, %c0_1] : memref<128x128xbf16, #tpu.memory_space<vmem>>, vector<128x128xbf16>
    %c0_2 = arith.constant 0 : index
    %c0_3 = arith.constant 0 : index
    %4 = vector.load %arg10[%c0_2, %c0_3] : memref<128x128xf32, #tpu.memory_space<vmem>>, vector<128x128xf32>
    %c0_4 = arith.constant 0 : index
    %c0_5 = arith.constant 0 : index
    %5 = vector.load %arg4[%c0_4, %c0_5] : memref<128x128xbf16, #tpu.memory_space<vmem>>, vector<128x128xbf16>
    %cst = arith.constant dense<0.000000e+00> : vector<128x128xf32>
    %6 = tpu.matmul %3, %5, %cst {dimension_numbers = #tpu.dot_dimension_numbers<[1], [0], [0], [1], [0, 0, 1, 1], [], []>} : vector<128x128xbf16>, vector<128x128xbf16>, vector<128x128xf32> -> vector<128x128xf32>
    %7 = arith.addf %4, %6 : vector<128x128xf32>
    %c0_6 = arith.constant 0 : index
    %c0_7 = arith.constant 0 : index
    %8 = vector.load %arg10[%c0_6, %c0_7] : memref<128x128xf32, #tpu.memory_space<vmem>>, vector<128x128xf32>
    tpu.vector_store %arg10[%c0_6, %c0_7], %7 {strides = array<i32>} : memref<128x128xf32, #tpu.memory_space<vmem>>, vector<128x128xf32>,
    %c0_i32_8 = arith.constant 0 : i32
    %9 = arith.cmpi eq, %arg2, %c0_i32_8 : i32
    %10 = arith.extui %9 : i1 to i32
    %c0_i32_9 = arith.constant 0 : i32
    %11 = arith.cmpi ne, %10, %c0_i32_9 : i32
    scf.if %11 {
      %c0_10 = arith.constant 0 : index
      %c0_11 = arith.constant 0 : index
      %12 = vector.load %arg10[%c0_10, %c0_11] : memref<128x128xf32, #tpu.memory_space<vmem>>, vector<128x128xf32>
      %13 = arith.truncf %12 : vector<128x128xf32> to vector<128x128xbf16>
      %c0_12 = arith.constant 0 : index
      %c0_13 = arith.constant 0 : index
      %14 = vector.load %arg7[%c0_12, %c0_13] : memref<128x128xbf16, #tpu.memory_space<vmem>>, vector<128x128xbf16>
      tpu.vector_store %arg7[%c0_12, %c0_13], %13 {strides = array<i32>} : memref<128x128xbf16, #tpu.memory_space<vmem>>, vector<128x128xbf16>,
      %cst_14 = arith.constant dense<0.000000e+00> : vector<128xf32>
      %15 = vector.multi_reduction <add>, %12, %cst_14 [0] : vector<128x128xf32> to vector<128xf32>
      %16 = vector.shape_cast %15 : vector<128xf32> to vector<1x1x128xf32>
      %c0_15 = arith.constant 0 : index
      %c0_16 = arith.constant 0 : index
      %c0_17 = arith.constant 0 : index
      %17 = vector.load %arg8[%c0_15, %c0_16, %c0_17] : memref<1x1x128xf32, #tpu.memory_space<vmem>>, vector<1x1x128xf32>
      tpu.vector_store %arg8[%c0_15, %c0_16, %c0_17], %16 {strides = array<i32>} : memref<1x1x128xf32, #tpu.memory_space<vmem>>, vector<1x1x128xf32>,
      %18 = arith.mulf %12, %12 : vector<128x128xf32>
      %cst_18 = arith.constant dense<0.000000e+00> : vector<128xf32>
      %19 = vector.multi_reduction <add>, %18, %cst_18 [0] : vector<128x128xf32> to vector<128xf32>
      %20 = vector.shape_cast %19 : vector<128xf32> to vector<1x1x128xf32>
      %c0_19 = arith.constant 0 : index
      %c0_20 = arith.constant 0 : index
      %c0_21 = arith.constant 0 : index
      %21 = vector.load %arg9[%c0_19, %c0_20, %c0_21] : memref<1x1x128xf32, #tpu.memory_space<vmem>>, vector<1x1x128xf32>
      tpu.vector_store %arg9[%c0_19, %c0_20, %c0_21], %20 {strides = array<i32>} : memref<1x1x128xf32, #tpu.memory_space<vmem>>, vector<1x1x128xf32>,
    } else {
    }
    return
  }
  func.func @transform_0(%arg0: i32, %arg1: i32, %arg2: i32) -> (i32, i32) {
    %c0_i32 = arith.constant 0 : i32
    return %arg0, %arg2 : i32, i32
  }
  func.func @transform_1(%arg0: i32, %arg1: i32, %arg2: i32) -> (i32, i32) {
    %c0_i32 = arith.constant 0 : i32
    return %arg2, %arg1 : i32, i32
  }
  func.func @transform_2(%arg0: i32, %arg1: i32, %arg2: i32) -> (i32, i32) {
    %c0_i32 = arith.constant 0 : i32
    %c0_i32_0 = arith.constant 0 : i32
    return %c0_i32, %arg2 : i32, i32
  }
  func.func @transform_3(%arg0: i32, %arg1: i32, %arg2: i32) -> (i32, i32) {
    %c0_i32 = arith.constant 0 : i32
    %c0_i32_0 = arith.constant 0 : i32
    return %c0_i32, %arg2 : i32, i32
  }
  func.func @transform_4(%arg0: i32, %arg1: i32, %arg2: i32) -> (i32, i32) {
    %c0_i32 = arith.constant 0 : i32
    return %arg0, %arg1 : i32, i32
  }
  func.func @transform_5(%arg0: i32, %arg1: i32, %arg2: i32) -> (i32, i32, i32) {
    %c0_i32 = arith.constant 0 : i32
    %c0_i32_0 = arith.constant 0 : i32
    return %arg0, %c0_i32, %arg1 : i32, i32, i32
  }
  func.func @transform_6(%arg0: i32, %arg1: i32, %arg2: i32) -> (i32, i32, i32) {
    %c0_i32 = arith.constant 0 : i32
    %c0_i32_0 = arith.constant 0 : i32
    return %arg0, %c0_i32, %arg1 : i32, i32, i32
  }
}

</mosaic_0001>

<bundles_post_ra>
// kernel: tpu_custom_call.1
= control target key start
LH: loop header
LB: loop body
LE: loop exit
PB: predicated region body
PF: predicated region fallthrough
CT: control target
= control target key end

     0   :  { %12 = vsyncpa [#allocation4], 0  ;;  %s991_s0 = inlined_call_operand.hbm [shape: bf16[128,128], index: 0, kind: input, shape index: {}]   ;;  %s992_s1 = inlined_call_operand.hbm [shape: bf16[128,128], index: 1, kind: input, shape index: {}]   ;;  %s993_s2 = inlined_call_operand.vmem [shape: f32[1,128], index: 2, kind: input, shape index: {}]   ;;  %s994_s3 = inlined_call_operand.vmem [shape: f32[1,128], index: 3, kind: input, shape index: {}]   ;;  %s995_s4 = inlined_call_operand.hbm [shape: bf16[128,128], index: 4, kind: output, shape index: {0}]   ;;  %s996_s5 = inlined_call_operand.hbm [shape: f32[1,1,128], index: 5, kind: output, shape index: {1}]   ;;  %s997_s6 = inlined_call_operand.hbm [shape: f32[1,1,128], index: 6, kind: output, shape index: {2}]  }
   0x1   :  { %13 = vsyncpa [#allocation7], 0 }
   0x2   :  { %14 = vsyncpa [#allocation5], 0 }
   0x3   :  { %15 = vsyncpa [#allocation10], 0  ;;  %s848_s21 = smov [#allocation3]   ;;  %s730_s3 = scalar_lea.hbm %s991_s0, 1024 }
   0x4   :  { %s21_s22 = sshll.u32 %s848_s21, 4  ;;  %p731_p0 = scmp.ne.s32.totalorder %s991_s0, %s730_s3  ;;  %s22_s22 = int_to_ptr.vmem [resolvable:$true] %s21_s22 }
   0x5   :  { %p734_p1 = scmp.lt.u32.totalorder %s730_s3, %s991_s0 }
   0x7   :  { %p736_p2 = pnand %p734_p1, %p731_p0 }
   0x9   :  { %739 = shalt.err (!%p736_p2)
}
   0xa   :  { %s740_s28 = scalar_lea.vmem %s22_s22, 1024  ;;  %p745_p4 = scmp.lt.s32.totalorder %s22_s22, %s22_s22 }
   0xb   :  { %p741_p3 = scmp.ne.s32.totalorder %s22_s22, %s740_s28  ;;  %p746_p5 = scmp.lt.s32.totalorder %s740_s28, %s740_s28 }
   0xd   :  { %p747_p6 = por %p746_p5, %p745_p4 }
   0xf   :  { %p748_p7 = pnand %p747_p6, %p741_p3 }
  0x11   :  { %751 = shalt.err (!%p748_p7)
}
  0x12   :  { %s849_s29 = smov 64   ;;  %s850_s30 = smov 4  }
  0x13   :  { %27 = dma.hbm_to_vmem [thread:$0]  %s991_s0, 1024, %s22_s22, [#allocation4], %s849_s29, %s849_s29, %s850_s30  }
  0x14   :  { %s851_s9 = smov [#allocation6]   ;;  %s752_s13 = scalar_lea.hbm %s992_s1, 1024 }
  0x15   :  { %s33_s10 = sshll.u32 %s851_s9, 4  ;;  %p753_p8 = scmp.ne.s32.totalorder %s992_s1, %s752_s13  ;;  %s34_s10 = int_to_ptr.vmem [resolvable:$true] %s33_s10 }
  0x16   :  { %p756_p9 = scmp.lt.u32.totalorder %s752_s13, %s992_s1 }
  0x18   :  { %p758_p10 = pnand %p756_p9, %p753_p8 }
  0x1a   :  { %761 = shalt.err (!%p758_p10)
}
  0x1b   :  { %s762_s18 = scalar_lea.vmem %s34_s10, 1024  ;;  %p767_p12 = scmp.lt.s32.totalorder %s34_s10, %s34_s10 }
  0x1c   :  { %p763_p11 = scmp.ne.s32.totalorder %s34_s10, %s762_s18  ;;  %p768_p13 = scmp.lt.s32.totalorder %s762_s18, %s762_s18 }
  0x1e   :  { %p769_p0 = por %p768_p13, %p767_p12 }
  0x20   :  { %p770_p1 = pnand %p769_p0, %p763_p11 }
  0x22   :  { %773 = shalt.err (!%p770_p1)
}
  0x23   :  { %39 = dma.hbm_to_vmem [thread:$0]  %s992_s1, 1024, %s34_s10, [#allocation7], %s849_s29, %s849_s29, %s850_s30  }
  0x24   :  { %840 = dma.done.wait [#allocation4], 1024  }
  0x25   :  { %841 = vsyncadd [#allocation4], 4294966272 }
  0x26   :  { %842 = dma.done.wait [#allocation7], 1024  }
  0x27   :  { %843 = vsyncadd [#allocation7], 4294966272  ;;  %v714_v0 = vld [vmem:[#allocation6] sm:$0xff]   ;;  %v715_v1 = vld [vmem:[#allocation6 + $0x8] sm:$0xff]   ;;  %s852_s1 = smov [#allocation8]  }
  0x28   :  { %659 = vmatprep.subr.bf16.mxu0 %v714_v0  ;;  %691 = vmatprep.subr.bf16.mxu1 %v714_v0  ;;  %v716_v2 = vld [vmem:[#allocation6 + $0x10] sm:$0xff]   ;;  %v717_v3 = vld [vmem:[#allocation6 + $0x18] sm:$0xff]   ;;  %v722_v4 = vld [vmem:[#allocation3] sm:$0xff]   ;;  %s508_s20 = sshll.u32 %s852_s1, 4  ;;  %s509_s20 = int_to_ptr.vmem [resolvable:$true] %s508_s20 }
  0x29   :  { %660 = vmatpush3.bf16.msra.mxu0 %v714_v0  ;;  %699 = vmatpush3.bf16.msra.mxu1 %v714_v0  ;;  %v718_v5 = vld [vmem:[#allocation6 + $0x20] sm:$0xff]   ;;  %v719_v7 = vld [vmem:[#allocation6 + $0x28] sm:$0xff]   ;;  %v720_v8 = vld [vmem:[#allocation6 + $0x30] sm:$0xff]   ;;  %s774_s21 = scalar_lea.vmem %s509_s20, 1024  ;;  %p779_p3 = scmp.lt.s32.totalorder %s509_s20, %s509_s20 }
  0x2a   :  { %661 = vmatprep.subr.bf16.mxu0 %v715_v1  ;;  %692 = vmatprep.subr.bf16.mxu1 %v715_v1  ;;  %v726_v6 = vld [vmem:[#allocation3 + $0x20] sm:$0xff]   ;;  %v721_v9 = vld [vmem:[#allocation6 + $0x38] sm:$0xff]   ;;  %v723_v10 = vld [vmem:[#allocation3 + $0x8] sm:$0xff]   ;;  %p775_p2 = scmp.ne.s32.totalorder %s509_s20, %s774_s21  ;;  %p780_p4 = scmp.lt.s32.totalorder %s774_s21, %s774_s21 }
  0x2b   :  { %675 = vmatprep.mubr.bf16.mxu0 %v722_v4  ;;  %683 = vmatprep.mubr.bf16.mxu1 %v726_v6  ;;  %v727_v11 = vld [vmem:[#allocation3 + $0x28] sm:$0xff]   ;;  %v724_v12 = vld [vmem:[#allocation3 + $0x10] sm:$0xff]   ;;  %v725_v14 = vld [vmem:[#allocation3 + $0x18] sm:$0xff]  }
  0x2c   :  { %v728_v13 = vld [vmem:[#allocation3 + $0x30] sm:$0xff]   ;;  %v729_v15 = vld [vmem:[#allocation3 + $0x38] sm:$0xff]   ;;  %p781_p5 = por %p780_p4, %p779_p3 }
  0x2d   :  { %662 = vmatpush3.bf16.msra.mxu0 %v715_v1  ;;  %700 = vmatpush3.bf16.msra.mxu1 %v715_v1 }
  0x2e   :  { %663 = vmatprep.subr.bf16.mxu0 %v716_v2  ;;  %693 = vmatprep.subr.bf16.mxu1 %v716_v2  ;;  %p782_p6 = pnand %p781_p5, %p775_p2 }
  0x31   :  { %664 = vmatpush3.bf16.msra.mxu0 %v716_v2  ;;  %701 = vmatpush3.bf16.msra.mxu1 %v716_v2 }
  0x32   :  { %665 = vmatprep.subr.bf16.mxu0 %v717_v3  ;;  %694 = vmatprep.subr.bf16.mxu1 %v717_v3 }
  0x35   :  { %666 = vmatpush3.bf16.msra.mxu0 %v717_v3  ;;  %702 = vmatpush3.bf16.msra.mxu1 %v717_v3 }
  0x36   :  { %667 = vmatprep.subr.bf16.mxu0 %v718_v5  ;;  %695 = vmatprep.subr.bf16.mxu1 %v718_v5 }
  0x39   :  { %668 = vmatpush3.bf16.msra.mxu0 %v718_v5  ;;  %703 = vmatpush3.bf16.msra.mxu1 %v718_v5 }
  0x3a   :  { %669 = vmatprep.subr.bf16.mxu0 %v719_v7  ;;  %696 = vmatprep.subr.bf16.mxu1 %v719_v7 }
  0x3d   :  { %670 = vmatpush3.bf16.msra.mxu0 %v719_v7  ;;  %704 = vmatpush3.bf16.msra.mxu1 %v719_v7 }
  0x3e   :  { %671 = vmatprep.subr.bf16.mxu0 %v720_v8  ;;  %697 = vmatprep.subr.bf16.mxu1 %v720_v8 }
  0x41   :  { %672 = vmatpush3.bf16.msra.mxu0 %v720_v8  ;;  %705 = vmatpush3.bf16.msra.mxu1 %v720_v8 }
  0x42   :  { %673 = vmatprep.subr.bf16.mxu0 %v721_v9  ;;  %698 = vmatprep.subr.bf16.mxu1 %v721_v9 }
  0x45   :  { %674 = vmatpush3.bf16.msra.mxu0 %v721_v9  ;;  %706 = vmatpush3.bf16.msra.mxu1 %v721_v9 }
  0x48   :  { %676 = vmatmul.mubr.bf16.vlgmr.msra.gmra.mrb[0].mxu0 %v723_v10  ;;  %684 = vmatmul.mubr.bf16.vlgmr.msra.gmra.mrb[0].mxu1 %v727_v11 }
  0x49   :  { %679 = vmatprep.mubr.bf16.mxu0 %v724_v12  ;;  %687 = vmatprep.mubr.bf16.mxu1 %v728_v13 }
  0x50   :  { %680 = vmatmul.mubr.bf16.gmra.mrb[4].mxu0 %v725_v14  ;;  %688 = vmatmul.mubr.bf16.gmra.mrb[4].mxu1 %v729_v15 }
 0x11b   :  { %v677_v16 = vpop.f32.mrb[0].mxu0  ;;  %v920_v17 = vpop.f32.mrb[0].mxu1 }
 0x11c   :  { %v249_v18 = vpop.f32.mrb[1].mxu0  ;;  %v922_v19 = vpop.f32.mrb[1].mxu1  ;;  %v467_v31 = vmul.f32 %v677_v16, %v677_v16 }
 0x11d   :  { %v678_v20 = vpop.f32.mrb[2].mxu0  ;;  %v924_v21 = vpop.f32.mrb[2].mxu1  ;;  %v465_v22 = vmul.f32 %v249_v18, %v249_v18  ;;  %v473_v61 = vmul.f32 %v922_v19, %v922_v19 }
 0x11e   :  { %v604_v23 = vpack.c.bf16 %v678_v20, %v677_v16  ;;  %v252_v24 = vpop.f32.mrb[3].mxu0  ;;  %v624_v25 = vpack.c.bf16 %v924_v21, %v920_v17  ;;  %v928_v26 = vpop.f32.mrb[3].mxu1  ;;  %v468_v34 = vmul.f32 %v678_v20, %v678_v20 }
 0x11f   :  { %v599_v27 = vpack.c.bf16 %v252_v24, %v249_v18  ;;  %v443_v28 = vadd.f32 %v252_v24, %v249_v18  ;;  %v466_v29 = vmul.f32 %v252_v24, %v252_v24  ;;  %v619_v30 = vpack.c.bf16 %v928_v26, %v922_v19 }
 0x120   :  { %636 = vst [vmem:[#allocation8 + $0x8] sm:$0xff] %v604_v23   ;;  %640 = vst [vmem:[#allocation8 + $0x28] sm:$0xff] %v624_v25  }
 0x121   :  { %600 = vst [vmem:[#allocation8] sm:$0xff] %v599_v27   ;;  %v444_v32 = vadd.f32 %v677_v16, %v443_v28  ;;  %v481_v33 = vadd.f32 %v466_v29, %v465_v22  ;;  %639 = vst [vmem:[#allocation8 + $0x20] sm:$0xff] %v619_v30  }
 0x123   :  { %v482_v35 = vadd.f32 %v481_v33, %v467_v31  ;;  %v681_v36 = vpop.f32.mrb[4].mxu0  ;;  %v445_v37 = vadd.f32 %v678_v20, %v444_v32  ;;  %v689_v38 = vpop.f32.mrb[4].mxu1 }
 0x124   :  { %v265_v39 = vpop.f32.mrb[5].mxu0  ;;  %v297_v40 = vpop.f32.mrb[5].mxu1  ;;  %v471_v55 = vmul.f32 %v681_v36, %v681_v36 }
 0x125   :  { %v446_v41 = vadd.f32 %v445_v37, %v265_v39  ;;  %v469_v42 = vmul.f32 %v265_v39, %v265_v39  ;;  %v483_v43 = vadd.f32 %v482_v35, %v468_v34  ;;  %v682_v44 = vpop.f32.mrb[6].mxu0  ;;  %v690_v45 = vpop.f32.mrb[6].mxu1 }
 0x126   :  { %v614_v46 = vpack.c.bf16 %v682_v44, %v681_v36  ;;  %v268_v47 = vpop.f32.mrb[7].mxu0  ;;  %v634_v48 = vpack.c.bf16 %v690_v45, %v689_v38  ;;  %v300_v49 = vpop.f32.mrb[7].mxu1  ;;  %v472_v58 = vmul.f32 %v682_v44, %v682_v44 }
 0x127   :  { %v484_v50 = vadd.f32 %v483_v43, %v469_v42  ;;  %v609_v51 = vpack.c.bf16 %v268_v47, %v265_v39  ;;  %v447_v52 = vadd.f32 %v446_v41, %v268_v47  ;;  %v470_v53 = vmul.f32 %v268_v47, %v268_v47 }
 0x128   :  { %638 = vst [vmem:[#allocation8 + $0x18] sm:$0xff] %v614_v46   ;;  %642 = vst [vmem:[#allocation8 + $0x38] sm:$0xff] %v634_v48   ;;  %v629_v54 = vpack.c.bf16 %v300_v49, %v297_v40 }
 0x129   :  { %637 = vst [vmem:[#allocation8 + $0x10] sm:$0xff] %v609_v51   ;;  %v448_v56 = vadd.f32 %v681_v36, %v447_v52  ;;  %v485_v57 = vadd.f32 %v484_v50, %v470_v53 }
 0x12a   :  { %641 = vst [vmem:[#allocation8 + $0x30] sm:$0xff] %v629_v54  }
 0x12b   :  { %v486_v59 = vadd.f32 %v485_v57, %v471_v55  ;;  %v449_v60 = vadd.f32 %v682_v44, %v448_v56 }
 0x12c   :  { %785 = shalt.err (!%p782_p6)
}
 0x12d   :  { %s786_s23 = scalar_lea.hbm %s995_s4, 1024 }
 0x12e   :  { %p787_p7 = scmp.ne.s32.totalorder %s995_s4, %s786_s23  ;;  %p790_p8 = scmp.lt.u32.totalorder %s786_s23, %s995_s4 }
 0x130   :  { %p792_p9 = pnand %p790_p8, %p787_p7 }
 0x132   :  { %795 = shalt.err (!%p792_p9)
}
 0x133   :  { %514 = dma.vmem_to_hbm [thread:$0]  %s509_s20, 1024, %s995_s4, [#allocation5], %s849_s29, %s849_s29, %s850_s30   ;;  %v450_v62 = vadd.f32 %v449_v60, %v922_v19  ;;  %v487_v63 = vadd.f32 %v486_v59, %v472_v58  ;;  %v474_v2 = vmul.f32 %v928_v26, %v928_v26  ;;  %v475_v3 = vmul.f32 %v920_v17, %v920_v17 }
 0x134   :  { %v476_v6 = vmul.f32 %v924_v21, %v924_v21  ;;  %v477_v9 = vmul.f32 %v297_v40, %v297_v40  ;;  %v478_v14 = vmul.f32 %v300_v49, %v300_v49  ;;  %v479_v15 = vmul.f32 %v689_v38, %v689_v38  ;;  %s853_s4 = smov [#allocation9]   ;;  %s854_s30 = smov [#allocation11]  }
 0x135   :  { %v488_v0 = vadd.f32 %v487_v63, %v473_v61  ;;  %v451_v1 = vadd.f32 %v450_v62, %v928_v26  ;;  %v480_v19 = vmul.f32 %v690_v45, %v690_v45  ;;  %s521_s29 = sshll.u32 %s853_s4, 4  ;;  %s531_s7 = sshll.u32 %s854_s30, 4  ;;  %s522_s29 = int_to_ptr.vmem [resolvable:$true] %s521_s29  ;;  %s959_s7 = int_to_ptr.vmem [resolvable:$true] %s531_s7 }
 0x136   :  { %s796_s8 = scalar_lea.vmem %s522_s29, 16  ;;  %s800_s9 = scalar_lea.vmem %s522_s29, 32 }
 0x137   :  { %v452_v4 = vadd.f32 %v920_v17, %v451_v1  ;;  %v489_v5 = vadd.f32 %v488_v0, %v474_v2  ;;  %p797_p10 = scmp.ne.s32.totalorder %s522_s29, %s796_s8  ;;  %p801_p11 = scmp.lt.s32.totalorder %s522_s29, %s522_s29 }
 0x138   :  { %p802_p12 = scmp.lt.s32.totalorder %s800_s9, %s796_s8 }
 0x139   :  { %v490_v7 = vadd.f32 %v489_v5, %v475_v3  ;;  %v453_v8 = vadd.f32 %v924_v21, %v452_v4 }
 0x13a   :  { %p803_p13 = por %p802_p12, %p801_p11 }
 0x13b   :  { %v454_v10 = vadd.f32 %v453_v8, %v297_v40  ;;  %v491_v11 = vadd.f32 %v490_v7, %v476_v6 }
 0x13c   :  { %p804_p0 = pnand %p803_p13, %p797_p10 }
 0x13d   :  { %v492_v12 = vadd.f32 %v491_v11, %v477_v9  ;;  %v455_v13 = vadd.f32 %v454_v10, %v300_v49 }
 0x13f   :  { %v456_v16 = vadd.f32 %v689_v38, %v455_v13  ;;  %v493_v18 = vadd.f32 %v492_v12, %v478_v14 }
 0x141   :  { %v457_v20 = vadd.f32 %v690_v45, %v456_v16  ;;  %v494_v22 = vadd.f32 %v493_v18, %v479_v15 }
 0x143   :  { %v458_v17 = vrot.slane %v457_v20, 4  ;;  %v495_v23 = vadd.f32 %v494_v22, %v480_v19 }
 0x145   :  { %v496_v24 = vrot.slane %v495_v23, 4  ;;  %v459_v25 = vadd.f32 %v458_v17, %v457_v20 }
 0x147   :  { %v460_v26 = vrot.slane %v459_v25, 2  ;;  %v497_v27 = vadd.f32 %v496_v24, %v495_v23 }
 0x149   :  { %v461_v28 = vadd.f32 %v460_v26, %v459_v25  ;;  %v498_v21 = vrot.slane %v497_v27, 2 }
 0x14b   :  { %v462_v29 = vrot.slane %v461_v28, 1  ;;  %v499_v30 = vadd.f32 %v498_v21, %v497_v27 }
 0x14d   :  { %v463_v31 = vadd.f32 %v462_v29, %v461_v28  ;;  %v500_v32 = vrot.slane %v499_v30, 1 }
 0x14f   :  { %464 = vst [vmem:[#allocation9] sm:$0x1] %v463_v31  ;;  %v501_v33 = vadd.f32 %v500_v32, %v499_v30 }
 0x150   :  { %807 = shalt.err (!%p804_p0)
}
 0x151   :  { %s808_s12 = scalar_lea.hbm %s996_s5, 16 }
 0x152   :  { %p809_p1 = scmp.ne.s32.totalorder %s996_s5, %s808_s12  ;;  %p812_p2 = scmp.lt.u32.totalorder %s808_s12, %s996_s5 }
 0x154   :  { %p814_p3 = pnand %p812_p2, %p809_p1 }
 0x156   :  { %817 = shalt.err (!%p814_p3)
}
 0x157   :  { %524 = dma.vmem_to_hbm [thread:$0]  %s522_s29, 16, %s996_s5, [#allocation10]   ;;  %502 = vst [vmem:[#allocation11] sm:$0x1] %v501_v33 }
 0x158   :  { %s818_s0 = scalar_lea.vmem %s959_s7, 16  ;;  %s822_s19 = scalar_lea.vmem %s959_s7, 32 }
 0x159   :  { %p819_p4 = scmp.ne.s32.totalorder %s959_s7, %s818_s0  ;;  %p823_p5 = scmp.lt.s32.totalorder %s959_s7, %s959_s7 }
 0x15a   :  { %p824_p6 = scmp.lt.s32.totalorder %s822_s19, %s818_s0 }
 0x15c   :  { %p825_p7 = por %p824_p6, %p823_p5 }
 0x15e   :  { %p826_p8 = pnand %p825_p7, %p819_p4 }
 0x160   :  { %829 = shalt.err (!%p826_p8)
}
 0x161   :  { %s830_s21 = scalar_lea.hbm %s997_s6, 16 }
 0x162   :  { %p831_p9 = scmp.ne.s32.totalorder %s997_s6, %s830_s21  ;;  %p834_p10 = scmp.lt.u32.totalorder %s830_s21, %s997_s6 }
 0x164   :  { %p836_p11 = pnand %p834_p10, %p831_p9 }
 0x166   :  { %839 = shalt.err (!%p836_p11)
}
 0x167   :  { %534 = dma.vmem_to_hbm [thread:$0]  %s959_s7, 16, %s997_s6, [#allocation10]  }
 0x168   :  { %844 = dma.done.wait [#allocation5], 1024  }
 0x169   :  { %845 = vsyncadd [#allocation5], 4294966272 }
 0x16a   :  { %846 = dma.done.wait [#allocation10], 32  }
 0x16b   :  { %847 = vsyncadd [#allocation10], 4294967264 }
 0x16c   :  { %544 = vsyncpa [#allocation4], 1 }
 0x16d   :  { %545 = vsyncpa [#allocation7], 1 }
 0x16e   :  { %546 = vsyncpa [#allocation5], 1 }
 0x16f   :  { %547 = vsyncpa [#allocation10], 1 }

</bundles_post_ra>
